<compile_context>
chip_gen: v5e
topology: v5e:2x2
jax: 0.10.0
libtpu: 0.0.40
codegen_flags: <defaults>
</compile_context>

<pallas_src>
import jax
import jax.numpy as jnp
from jax.experimental import pallas as pl
from jax.experimental.pallas import tpu as pltpu


def _prelu_kernel_per_row(x_ref, a_ref, o_ref):
    x = x_ref[...]                      # (tm, tn) tile
    a = a_ref[...]                      # (tm, 1) per-row alpha, broadcasts over lanes
    o_ref[...] = jnp.where(x > 0, x, a * x)


def _prelu_kernel_scalar(a_ref, x_ref, o_ref):
    x = x_ref[...]                      # (tm, tn) tile
    a = a_ref[0, 0].astype(x.dtype)     # scalar alpha from SMEM
    o_ref[...] = jnp.where(x > 0, x, a * x)


def prelu_pallas(x, alpha):
    """x: (N, C, H, W).  alpha: (num_parameters,) with num_parameters in {1, C}."""
    N, C, H, W = x.shape
    rows, cols = N * C, H * W
    dtype = x.dtype
    itemsize = jnp.dtype(dtype).itemsize
    sub = {4: 8, 2: 16, 1: 32}.get(itemsize, 8)   # sublane packing factor

    x2d = x.reshape(rows, cols)          # contiguous view, free

    # --- Tile selection: prefer full contiguous rows, VMEM-budgeted. ---
    TILE_BYTES = 8 * 1024 * 1024         # per tile buffer
    row_bytes = cols * itemsize
    if sub * row_bytes <= TILE_BYTES:
        # Full-row tiles: one linear HBM stream per block.
        tn = cols
        tm = min(rows, (TILE_BYTES // row_bytes) // sub * sub)
    else:
        # Very wide rows: split columns, keep tm at one sublane group.
        tm = min(rows, sub)
        tn = min(cols, max(128, (TILE_BYTES // (tm * itemsize)) // 128 * 128))

    # Megacore: try to keep >= 2 programs, splitting rows first so each
    # TensorCore gets a disjoint contiguous row band.  Column splits must
    # keep DMA segments >= ~2 KiB (bandwidth-bound kernel).
    tn_min = max(128, ((2048 // itemsize + 127) // 128) * 128)
    if pl.cdiv(rows, tm) * pl.cdiv(cols, tn) < 2:
        if tm > sub:
            tm = max(sub, ((tm // 2 + sub - 1) // sub) * sub)
        elif tn > tn_min and cols > tn_min:
            tn = max(tn_min, ((tn // 2 + 127) // 128) * 128)

    grid = (pl.cdiv(rows, tm), pl.cdiv(cols, tn))
    x_spec = pl.BlockSpec((tm, tn), lambda i, j: (i, j))
    out_spec = pl.BlockSpec((tm, tn), lambda i, j: (i, j))
    params = pltpu.CompilerParams(
        dimension_semantics=("parallel", "parallel"),
        vmem_limit_bytes=48 * 1024 * 1024,
    )
    out_shape = jax.ShapeDtypeStruct((rows, cols), dtype)

    if alpha.shape[0] == 1:
        # Scalar-alpha fast path: (1,1) f32 scalar in SMEM, no side DMA stream.
        a_smem = alpha.reshape(1, 1).astype(jnp.float32)
        out2d = pl.pallas_call(
            _prelu_kernel_scalar,
            out_shape=out_shape,
            grid=grid,
            in_specs=[
                pl.BlockSpec(memory_space=pltpu.MemorySpace.SMEM),
                x_spec,
            ],
            out_specs=out_spec,
            compiler_params=params,
        )(a_smem, x2d)
    else:
        assert alpha.shape[0] == C, "num_parameters must be 1 or C"
        # Per-channel alpha -> per-row alpha (tiny glue, negligible traffic).
        a_rows = jnp.tile(alpha.astype(dtype), (N,)).reshape(rows, 1)
        out2d = pl.pallas_call(
            _prelu_kernel_per_row,
            out_shape=out_shape,
            grid=grid,
            in_specs=[
                x_spec,
                pl.BlockSpec((tm, 1), lambda i, j: (i, 0)),
            ],
            out_specs=out_spec,
            compiler_params=params,
        )(x2d, a_rows)

    return out2d.reshape(N, C, H, W)


if __name__ == "__main__":
    # Model(num_parameters=C, init=0.25) applied to an NCHW tensor.
    N, C, H, W = 2, 4, 16, 16
    init = 0.25

    key = jax.random.PRNGKey(0)
    x = jax.random.normal(key, (N, C, H, W), dtype=jnp.float32)

    # Per-channel alpha (num_parameters=C).
    alpha_c = jnp.full((C,), init, dtype=jnp.float32)
    y = prelu_pallas(x, alpha_c)
    jax.block_until_ready(y)
    y_ref = jnp.where(x > 0, x, alpha_c.reshape(1, C, 1, 1) * x)
    assert jnp.allclose(y, y_ref, atol=1e-6), "per-channel mismatch vs reference"

    # Scalar alpha (num_parameters=1, the module default).
    alpha_1 = jnp.full((1,), init, dtype=jnp.float32)
    y1 = prelu_pallas(x, alpha_1)
    jax.block_until_ready(y1)
    y1_ref = jnp.where(x > 0, x, init * x)
    assert jnp.allclose(y1, y1_ref, atol=1e-6), "scalar mismatch vs reference"

    print("KERNEL_OK")
</pallas_src>

<mosaic_0001>
module attributes {stable_mosaic.version = 11 : i64} {
  func.func @_prelu_kernel_per_row(%arg0: i32, %arg1: i32, %arg2: memref<8x256xf32, #tpu.memory_space<vmem>>, %arg3: memref<8x1xf32, #tpu.memory_space<vmem>>, %arg4: memref<8x256xf32, #tpu.memory_space<vmem>>) attributes {dimension_semantics = [#tpu.dimension_semantics<parallel>, #tpu.dimension_semantics<parallel>], iteration_bounds = array<i64: 1, 1>, scalar_prefetch = 0 : i64, scratch_operands = 0 : i64, tpu.core_type = #tpu.core_type<tc>, window_params = [{transform_indices = @transform_0, window_bounds = array<i64: 8, 256>}, {transform_indices = @transform_1, window_bounds = array<i64: 8, 1>}, {transform_indices = @transform_2, window_bounds = array<i64: 8, 256>}]} {
    %c0 = arith.constant 0 : index
    %c0_0 = arith.constant 0 : index
    %0 = vector.load %arg2[%c0, %c0_0] : memref<8x256xf32, #tpu.memory_space<vmem>>, vector<8x256xf32>
    %c0_1 = arith.constant 0 : index
    %c0_2 = arith.constant 0 : index
    %1 = vector.load %arg3[%c0_1, %c0_2] : memref<8x1xf32, #tpu.memory_space<vmem>>, vector<8x1xf32>
    %cst = arith.constant 0.000000e+00 : f32
    %2 = vector.broadcast %cst : f32 to vector<8x256xf32>
    %3 = arith.cmpf ogt, %0, %2 : vector<8x256xf32>
    %4 = vector.broadcast %1 : vector<8x1xf32> to vector<8x256xf32>
    %5 = arith.mulf %4, %0 : vector<8x256xf32>
    %6 = arith.select %3, %0, %5 : vector<8x256xi1>, vector<8x256xf32>
    %c0_3 = arith.constant 0 : index
    %c0_4 = arith.constant 0 : index
    %7 = vector.load %arg4[%c0_3, %c0_4] : memref<8x256xf32, #tpu.memory_space<vmem>>, vector<8x256xf32>
    tpu.vector_store %arg4[%c0_3, %c0_4], %6 {strides = array<i32>} : memref<8x256xf32, #tpu.memory_space<vmem>>, vector<8x256xf32>,
    return
  }
  func.func @transform_0(%arg0: i32, %arg1: i32) -> (i32, i32) {
    %c0_i32 = arith.constant 0 : i32
    return %arg0, %arg1 : i32, i32
  }
  func.func @transform_1(%arg0: i32, %arg1: i32) -> (i32, i32) {
    %c0_i32 = arith.constant 0 : i32
    %c0_i32_0 = arith.constant 0 : i32
    return %arg0, %c0_i32 : i32, i32
  }
  func.func @transform_2(%arg0: i32, %arg1: i32) -> (i32, i32) {
    %c0_i32 = arith.constant 0 : i32
    return %arg0, %arg1 : i32, i32
  }
}

</mosaic_0001>

<bundles_post_ra>
// kernel: tpu_custom_call.1
= control target key start
LH: loop header
LB: loop body
LE: loop exit
PB: predicated region body
PF: predicated region fallthrough
CT: control target
= control target key end

     0   :  { %7 = vsyncpa [#allocation3], 0  ;;  %s142_s0 = inlined_call_operand.hbm [shape: f32[8,256], index: 0, kind: input, shape index: {}]   ;;  %s143_s1 = inlined_call_operand.vmem [shape: f32[8,1], index: 1, kind: input, shape index: {}]   ;;  %s144_s2 = inlined_call_operand.hbm [shape: f32[8,256], index: 2, kind: output, shape index: {}]  }
   0x1   :  { %8 = vsyncpa [#allocation4], 0  ;;  %s14_s11 = sshll.u32 %s142_s0, 4  ;;  %s115_s12 = smov [#allocation2]   ;;  %s15_s11 = int_to_ptr.hbm [resolvable:$true] %s14_s11 }
   0x2   :  { %s16_s13 = sshll.u32 %s115_s12, 4  ;;  %s17_s13 = int_to_ptr.vmem [resolvable:$true] %s16_s13 }
   0x3   :  { %19 = dma.hbm_to_vmem [thread:$0]  %s15_s11, 256, %s17_s13, [#allocation3]  }
   0x4   :  { %111 = dma.done.wait [#allocation3], 256  }
   0x5   :  { %112 = vsyncadd [#allocation3], 4294967040  ;;  %v116_v0 = vmov 0   ;;  %v28_v1 = vld [vmem:[%s143_s1] sm:$0xff]  ;;  %v27_v3 = vld [vmem:[#allocation2 + $0x8] sm:$0xff]  ;;  %s117_s0 = smov [#allocation5]  }
   0x6   :  { %62 = vset.pattern.permute.xlu0 %v116_v0  ;;  %v26_v2 = vld [vmem:[#allocation2] sm:$0xff]  ;;  %vm30_vm1 = vcmp.gt.f32.partialorder %v27_v3, 0.0  ;;  %s47_s16 = sshll.u32 %s117_s0, 4  ;;  %s49_s19 = sshll.u32 %s144_s2, 4  ;;  %s48_s16 = int_to_ptr.vmem [resolvable:$true] %s47_s16  ;;  %s50_s19 = int_to_ptr.hbm [resolvable:$true] %s49_s19 }
   0x7   :  { %33 = vperm.xlu0 %62, %v28_v1   ;;  %vm29_vm0 = vcmp.gt.f32.partialorder %v26_v2, 0.0 }
  0x79   :  { %v34_v4 = vpop.permute.xlu0 %33 }
  0x7a   :  { %v36_v5 = vmul.f32 %v34_v4, %v26_v2  ;;  %v37_v6 = vmul.f32 %v34_v4, %v27_v3 }
  0x7c   :  { %v38_v7 = vsel %vm29_vm0, %v26_v2, %v36_v5  ;;  %v39_v8 = vsel %vm30_vm1, %v27_v3, %v37_v6 }
  0x7d   :  { %40 = vst [vmem:[#allocation5] sm:$0xff] %v38_v7 }
  0x7e   :  { %41 = vst [vmem:[#allocation5 + $0x8] sm:$0xff] %v39_v8 }
  0x7f   :  { %52 = dma.vmem_to_hbm [thread:$0]  %s48_s16, 256, %s50_s19, [#allocation4]  }
  0x80   :  { %113 = dma.done.wait [#allocation4], 256  }
  0x81   :  { %114 = vsyncadd [#allocation4], 4294967040 }
  0x82   :  { %57 = vsyncpa [#allocation3], 1 }
  0x83   :  { %58 = vsyncpa [#allocation4], 1 }

</bundles_post_ra>
